<compile_context>
chip_gen: v7x
topology: tpu7x:2x2x1
jax: 0.10.0
libtpu: 0.0.40
codegen_flags: <defaults>
</compile_context>

<pallas_src>
import jax
import jax.numpy as jnp
from jax.experimental import pallas as pl
from jax.experimental.pallas import tpu as pltpu


def _round_up(x: int, m: int) -> int:
    return ((x + m - 1) // m) * m


def _pick_tm(b_pad_rows: int, cap: int = 512) -> int:
    """Largest multiple of 8 <= cap that divides b_pad_rows; halved when that
    would leave a single grid step (keeps both v7x TensorCores busy)."""
    tm = min(cap, b_pad_rows)
    tm -= tm % 8
    tm = max(tm, 8)
    while b_pad_rows % tm:
        tm -= 8
    if b_pad_rows // tm == 1 and tm % 16 == 0:
        tm //= 2
    return tm


def _vmem_limit_bytes(tm: int, d_in: int, d_pad: int) -> int:
    resident = d_in * d_pad * 2 + 2 * d_pad * 4            # bf16 W + f32 bias/mask (1 buffer each)
    streamed = 2 * tm * d_in * 4 + 2 * tm * d_pad * 4      # double-buffered x / out tiles
    want = int(1.5 * (resident + streamed)) + (4 << 20)    # headroom for compiler scratch
    # Never request less than the scoped default; stay within v7x's 64 MiB physical VMEM.
    return max(32 << 20, min(want, 64 << 20))


def fined_network_kernel(x_ref, w_ref, b_ref, mask_ref, o_ref):
    """x:(TM,D_in) f32, w:(D_in,D_pad) bf16, b/mask:(1,D_pad) f32, o:(TM,D_pad) f32."""
    # bf16 MXU path with f32 accumulation.
    x = x_ref[...].astype(jnp.bfloat16)
    h = jnp.dot(x, w_ref[...], preferred_element_type=jnp.float32)
    h = h + b_ref[...]                 # bias (f32)
    h = jnp.maximum(h, 0.0)            # ReLU
    # Dropout(p=0.2) is identity at inference -> not applied.
    h = h + mask_ref[...]              # -1e30 on padded columns (post-ReLU) -> exp == 0
    # Numerically stable softmax over dim=1, kept in f32.
    m = jnp.max(h, axis=1, keepdims=True)
    e = jnp.exp(h - m)
    denom = jnp.sum(e, axis=1, keepdims=True)
    # Exact reciprocal: it only acts on a (TM,1) column, so approx=True saves nothing
    # measurable here and exact keeps rows summing to 1 at f32 rounding.
    o_ref[...] = (e * pl.reciprocal(denom, approx=False)).astype(o_ref.dtype)


def prepare_params(w, b):
    """One-time parameter setup (outside the per-call path).

    w: (D, D) torch-layout Linear weight (out_features, in_features), f32
    b: (D,) f32
    Returns (w_pad_bf16 (D_in, D_pad), b_pad (1, D_pad), col_mask (1, D_pad), d_in, d_out, d_pad).
    """
    d_out, d_in = w.shape
    assert b.shape == (d_out,)
    # Lane-dense output dim.  v6e/v7x MXU passes are 256 wide; use 256-multiples once the
    # matmul dominates, otherwise 128 is enough (demo shapes are HBM / overhead bound).
    lane = 256 if d_out >= 1024 else 128
    d_pad = _round_up(max(d_out, lane), lane)

    w_pad = jnp.zeros((d_in, d_pad), jnp.float32).at[:, :d_out].set(w.T).astype(jnp.bfloat16)
    b_pad = jnp.zeros((1, d_pad), jnp.float32).at[0, :d_out].set(b)
    col = jnp.arange(d_pad)
    col_mask = jnp.where(col < d_out, 0.0, -1e30).astype(jnp.float32).reshape(1, d_pad)
    return w_pad, b_pad, col_mask, d_in, d_out, d_pad


def fined_network_forward(x, w_pad, b_pad, col_mask, d_out, *, tm=None):
    """softmax(relu(x @ W^T + b), axis=1) via one fused Pallas kernel.

    x: (B, D_in) f32; w_pad: (D_in, D_pad) bf16; b_pad/col_mask: (1, D_pad) f32.
    """
    B, d_in = x.shape
    d_pad = w_pad.shape[1]
    assert w_pad.shape[0] == d_in and b_pad.shape == (1, d_pad) and col_mask.shape == (1, d_pad)

    # Batch padded only to a sublane multiple of 8 (no tm-sized padding copies).
    b_rows = _round_up(B, 8)
    x_p = x if b_rows == B else jnp.pad(x, ((0, b_rows - B), (0, 0)))

    if tm is None:
        tm = _pick_tm(b_rows)
    grid = (b_rows // tm,)

    compiler_params = pltpu.CompilerParams(
        dimension_semantics=("parallel",),
        vmem_limit_bytes=_vmem_limit_bytes(tm, d_in, d_pad),
    )
    out_shape = jax.ShapeDtypeStruct((b_rows, d_pad), jnp.float32)
    # TODO(synk): emit bf16 output (halves HBM writeback) when the consumer tolerates it.

    def build(single_buffer_resident: bool):
        resident_kw = dict(pipeline_mode=pl.Buffered(1)) if single_buffer_resident else {}
        return pl.pallas_call(
            fined_network_kernel,
            out_shape=out_shape,
            grid=grid,
            in_specs=[
                pl.BlockSpec((tm, d_in), lambda i: (i, 0)),                     # x: streamed
                pl.BlockSpec((d_in, d_pad), lambda i: (0, 0), **resident_kw),   # W: resident
                pl.BlockSpec((1, d_pad), lambda i: (0, 0), **resident_kw),      # bias: resident
                pl.BlockSpec((1, d_pad), lambda i: (0, 0), **resident_kw),      # mask: resident
            ],
            out_specs=pl.BlockSpec((tm, d_pad), lambda i: (i, 0)),
            compiler_params=compiler_params,
        )

    try:
        out = build(True)(x_p, w_pad, b_pad, col_mask)
    except Exception:
        # Fallback for JAX builds that reject pipeline_mode=pl.Buffered(1) on a
        # constant-index operand; only costs one extra buffer per resident input.
        out = build(False)(x_p, w_pad, b_pad, col_mask)

    return out[:B, :d_out]


def reference_forward(x, w, b):
    h = jnp.maximum(x @ w.T + b, 0.0)
    return jax.nn.softmax(h, axis=1)


if __name__ == "__main__":
    key = jax.random.PRNGKey(0)
    k_x, k_w, k_b = jax.random.split(key, 3)

    batch = 8
    input_dims = 32  # FinedNetwork(input_dims=32): Linear(32, 32) -> ReLU -> Dropout -> softmax

    x = jax.random.normal(k_x, (batch, input_dims), dtype=jnp.float32)
    # torch-layout Linear weight (out_features, in_features) + bias.
    # (The module's weight_init is a no-op -- the isinstance(nn.Linear) check is applied to
    #  the MLP module, not the Linear -- so any deterministic init is faithful.)
    w = jax.random.normal(k_w, (input_dims, input_dims), dtype=jnp.float32) * 0.1
    b = jax.random.normal(k_b, (input_dims,), dtype=jnp.float32) * 0.01

    # One-time parameter setup (transpose / pad / bf16 cast happen here, not per call).
    w_pad, b_pad, col_mask, d_in, d_out, d_pad = prepare_params(w, b)

    out = fined_network_forward(x, w_pad, b_pad, col_mask, d_out)
    out = jax.block_until_ready(out)

    ref = reference_forward(x, w, b)
    assert out.shape == (batch, input_dims)
    # bf16 matmul inputs -> loosened tolerance vs. the full-f32 reference.
    assert jnp.allclose(out, ref, atol=2e-2, rtol=2e-2), "mismatch vs reference"
    # Exact-reciprocal softmax: rows sum to 1 within f32 rounding.
    assert jnp.allclose(jnp.sum(out, axis=1), 1.0, atol=1e-3)

    print("KERNEL_OK")
</pallas_src>

<mosaic_0001>
module attributes {stable_mosaic.version = 11 : i64} {
  func.func @fined_network_kernel(%arg0: i32, %arg1: memref<8x32xf32, #tpu.memory_space<vmem>>, %arg2: memref<32x128xbf16, #tpu.memory_space<vmem>>, %arg3: memref<1x128xf32, #tpu.memory_space<vmem>>, %arg4: memref<1x128xf32, #tpu.memory_space<vmem>>, %arg5: memref<8x128xf32, #tpu.memory_space<vmem>>) attributes {dimension_semantics = [#tpu.dimension_semantics<parallel>], iteration_bounds = array<i64: 1>, scalar_prefetch = 0 : i64, scratch_operands = 0 : i64, tpu.core_type = #tpu.core_type<tc>, window_params = [{transform_indices = @transform_0, window_bounds = array<i64: 8, 32>}, {pipeline_mode = #tpu.pipeline_mode<synchronous>, transform_indices = @transform_1, window_bounds = array<i64: 32, 128>}, {pipeline_mode = #tpu.pipeline_mode<synchronous>, transform_indices = @transform_2, window_bounds = array<i64: 1, 128>}, {pipeline_mode = #tpu.pipeline_mode<synchronous>, transform_indices = @transform_3, window_bounds = array<i64: 1, 128>}, {transform_indices = @transform_4, window_bounds = array<i64: 8, 128>}]} {
    %c0 = arith.constant 0 : index
    %c0_0 = arith.constant 0 : index
    %0 = vector.load %arg1[%c0, %c0_0] : memref<8x32xf32, #tpu.memory_space<vmem>>, vector<8x32xf32>
    %1 = arith.truncf %0 : vector<8x32xf32> to vector<8x32xbf16>
    %c0_1 = arith.constant 0 : index
    %c0_2 = arith.constant 0 : index
    %2 = vector.load %arg2[%c0_1, %c0_2] : memref<32x128xbf16, #tpu.memory_space<vmem>>, vector<32x128xbf16>
    %cst = arith.constant dense<0.000000e+00> : vector<8x128xf32>
    %3 = tpu.matmul %1, %2, %cst {dimension_numbers = #tpu.dot_dimension_numbers<[1], [0], [0], [1], [0, 0, 1, 1], [], []>} : vector<8x32xbf16>, vector<32x128xbf16>, vector<8x128xf32> -> vector<8x128xf32>
    %c0_3 = arith.constant 0 : index
    %c0_4 = arith.constant 0 : index
    %4 = vector.load %arg3[%c0_3, %c0_4] : memref<1x128xf32, #tpu.memory_space<vmem>>, vector<1x128xf32>
    %5 = vector.broadcast %4 : vector<1x128xf32> to vector<8x128xf32>
    %6 = arith.addf %3, %5 : vector<8x128xf32>
    %cst_5 = arith.constant 0.000000e+00 : f32
    %7 = vector.broadcast %cst_5 : f32 to vector<8x128xf32>
    %8 = arith.maximumf %6, %7 : vector<8x128xf32>
    %c0_6 = arith.constant 0 : index
    %c0_7 = arith.constant 0 : index
    %9 = vector.load %arg4[%c0_6, %c0_7] : memref<1x128xf32, #tpu.memory_space<vmem>>, vector<1x128xf32>
    %10 = vector.broadcast %9 : vector<1x128xf32> to vector<8x128xf32>
    %11 = arith.addf %8, %10 : vector<8x128xf32>
    %cst_8 = arith.constant dense<0xFF800000> : vector<8xf32>
    %12 = vector.multi_reduction <maximumf>, %11, %cst_8 [1] : vector<8x128xf32> to vector<8xf32>
    %13 = vector.shape_cast %12 : vector<8xf32> to vector<8x1xf32>
    %14 = vector.broadcast %13 : vector<8x1xf32> to vector<8x128xf32>
    %15 = arith.subf %11, %14 : vector<8x128xf32>
    %16 = math.exp %15 : vector<8x128xf32>
    %cst_9 = arith.constant dense<0.000000e+00> : vector<8xf32>
    %17 = vector.multi_reduction <add>, %16, %cst_9 [1] : vector<8x128xf32> to vector<8xf32>
    %18 = vector.shape_cast %17 : vector<8xf32> to vector<8x1xf32>
    %19 = tpu.reciprocal %18 : vector<8x1xf32> -> vector<8x1xf32>
    %20 = vector.broadcast %19 : vector<8x1xf32> to vector<8x128xf32>
    %21 = arith.mulf %16, %20 : vector<8x128xf32>
    %c0_10 = arith.constant 0 : index
    %c0_11 = arith.constant 0 : index
    %22 = vector.load %arg5[%c0_10, %c0_11] : memref<8x128xf32, #tpu.memory_space<vmem>>, vector<8x128xf32>
    tpu.vector_store %arg5[%c0_10, %c0_11], %21 {strides = array<i32>} : memref<8x128xf32, #tpu.memory_space<vmem>>, vector<8x128xf32>,
    return
  }
  func.func @transform_0(%arg0: i32) -> (i32, i32) {
    %c0_i32 = arith.constant 0 : i32
    %c0_i32_0 = arith.constant 0 : i32
    return %arg0, %c0_i32 : i32, i32
  }
  func.func @transform_1(%arg0: i32) -> (i32, i32) {
    %c0_i32 = arith.constant 0 : i32
    %c0_i32_0 = arith.constant 0 : i32
    %c0_i32_1 = arith.constant 0 : i32
    return %c0_i32, %c0_i32_0 : i32, i32
  }
  func.func @transform_2(%arg0: i32) -> (i32, i32) {
    %c0_i32 = arith.constant 0 : i32
    %c0_i32_0 = arith.constant 0 : i32
    %c0_i32_1 = arith.constant 0 : i32
    return %c0_i32, %c0_i32_0 : i32, i32
  }
  func.func @transform_3(%arg0: i32) -> (i32, i32) {
    %c0_i32 = arith.constant 0 : i32
    %c0_i32_0 = arith.constant 0 : i32
    %c0_i32_1 = arith.constant 0 : i32
    return %c0_i32, %c0_i32_0 : i32, i32
  }
  func.func @transform_4(%arg0: i32) -> (i32, i32) {
    %c0_i32 = arith.constant 0 : i32
    %c0_i32_0 = arith.constant 0 : i32
    return %arg0, %c0_i32 : i32, i32
  }
}

module attributes {stable_mosaic.version = 11 : i64} {
  func.func @fined_network_kernel(%arg0: i32, %arg1: memref<8x32xf32, #tpu.memory_space<vmem>>, %arg2: memref<32x128xbf16, #tpu.memory_space<vmem>>, %arg3: memref<1x128xf32, #tpu.memory_space<vmem>>, %arg4: memref<1x128xf32, #tpu.memory_space<vmem>>, %arg5: memref<8x128xf32, #tpu.memory_space<vmem>>) attributes {dimension_semantics = [#tpu.dimension_semantics<parallel>], iteration_bounds = array<i64: 1>, scalar_prefetch = 0 : i64, scratch_operands = 0 : i64, tpu.core_type = #tpu.core_type<tc>, window_params = [{transform_indices = @transform_0, window_bounds = array<i64: 8, 32>}, {pipeline_mode = #tpu.pipeline_mode<synchronous>, transform_indices = @transform_1, window_bounds = array<i64: 32, 128>}, {pipeline_mode = #tpu.pipeline_mode<synchronous>, transform_indices = @transform_2, window_bounds = array<i64: 1, 128>}, {pipeline_mode = #tpu.pipeline_mode<synchronous>, transform_indices = @transform_3, window_bounds = array<i64: 1, 128>}, {transform_indices = @transform_4, window_bounds = array<i64: 8, 128>}]} {
    %c0 = arith.constant 0 : index
    %c0_0 = arith.constant 0 : index
    %0 = vector.load %arg1[%c0, %c0_0] : memref<8x32xf32, #tpu.memory_space<vmem>>, vector<8x32xf32>
    %1 = arith.truncf %0 : vector<8x32xf32> to vector<8x32xbf16>
    %c0_1 = arith.constant 0 : index
    %c0_2 = arith.constant 0 : index
    %2 = vector.load %arg2[%c0_1, %c0_2] : memref<32x128xbf16, #tpu.memory_space<vmem>>, vector<32x128xbf16>
    %cst = arith.constant dense<0.000000e+00> : vector<8x128xf32>
    %3 = tpu.matmul %1, %2, %cst {dimension_numbers = #tpu.dot_dimension_numbers<[1], [0], [0], [1], [0, 0, 1, 1], [], []>} : vector<8x32xbf16>, vector<32x128xbf16>, vector<8x128xf32> -> vector<8x128xf32>
    %c0_3 = arith.constant 0 : index
    %c0_4 = arith.constant 0 : index
    %4 = vector.load %arg3[%c0_3, %c0_4] : memref<1x128xf32, #tpu.memory_space<vmem>>, vector<1x128xf32>
    %5 = vector.broadcast %4 : vector<1x128xf32> to vector<8x128xf32>
    %6 = arith.addf %3, %5 : vector<8x128xf32>
    %cst_5 = arith.constant 0.000000e+00 : f32
    %7 = vector.broadcast %cst_5 : f32 to vector<8x128xf32>
    %8 = arith.maximumf %6, %7 : vector<8x128xf32>
    %c0_6 = arith.constant 0 : index
    %c0_7 = arith.constant 0 : index
    %9 = vector.load %arg4[%c0_6, %c0_7] : memref<1x128xf32, #tpu.memory_space<vmem>>, vector<1x128xf32>
    %10 = vector.broadcast %9 : vector<1x128xf32> to vector<8x128xf32>
    %11 = arith.addf %8, %10 : vector<8x128xf32>
    %cst_8 = arith.constant dense<0xFF800000> : vector<8xf32>
    %12 = vector.multi_reduction <maximumf>, %11, %cst_8 [1] : vector<8x128xf32> to vector<8xf32>
    %13 = vector.shape_cast %12 : vector<8xf32> to vector<8x1xf32>
    %14 = vector.broadcast %13 : vector<8x1xf32> to vector<8x128xf32>
    %15 = arith.subf %11, %14 : vector<8x128xf32>
    %16 = math.exp %15 : vector<8x128xf32>
    %cst_9 = arith.constant dense<0.000000e+00> : vector<8xf32>
    %17 = vector.multi_reduction <add>, %16, %cst_9 [1] : vector<8x128xf32> to vector<8xf32>
    %18 = vector.shape_cast %17 : vector<8xf32> to vector<8x1xf32>
    %19 = tpu.reciprocal %18 : vector<8x1xf32> -> vector<8x1xf32>
    %20 = vector.broadcast %19 : vector<8x1xf32> to vector<8x128xf32>
    %21 = arith.mulf %16, %20 : vector<8x128xf32>
    %c0_10 = arith.constant 0 : index
    %c0_11 = arith.constant 0 : index
    %22 = vector.load %arg5[%c0_10, %c0_11] : memref<8x128xf32, #tpu.memory_space<vmem>>, vector<8x128xf32>
    tpu.vector_store %arg5[%c0_10, %c0_11], %21 {strides = array<i32>} : memref<8x128xf32, #tpu.memory_space<vmem>>, vector<8x128xf32>,
    return
  }
  func.func @transform_0(%arg0: i32) -> (i32, i32) {
    %c0_i32 = arith.constant 0 : i32
    %c0_i32_0 = arith.constant 0 : i32
    return %arg0, %c0_i32 : i32, i32
  }
  func.func @transform_1(%arg0: i32) -> (i32, i32) {
    %c0_i32 = arith.constant 0 : i32
    %c0_i32_0 = arith.constant 0 : i32
    %c0_i32_1 = arith.constant 0 : i32
    return %c0_i32, %c0_i32_0 : i32, i32
  }
  func.func @transform_2(%arg0: i32) -> (i32, i32) {
    %c0_i32 = arith.constant 0 : i32
    %c0_i32_0 = arith.constant 0 : i32
    %c0_i32_1 = arith.constant 0 : i32
    return %c0_i32, %c0_i32_0 : i32, i32
  }
  func.func @transform_3(%arg0: i32) -> (i32, i32) {
    %c0_i32 = arith.constant 0 : i32
    %c0_i32_0 = arith.constant 0 : i32
    %c0_i32_1 = arith.constant 0 : i32
    return %c0_i32, %c0_i32_0 : i32, i32
  }
  func.func @transform_4(%arg0: i32) -> (i32, i32) {
    %c0_i32 = arith.constant 0 : i32
    %c0_i32_0 = arith.constant 0 : i32
    return %arg0, %c0_i32 : i32, i32
  }
}

</mosaic_0001>

<bundles_post_ra>
// kernel: tpu_custom_call.1
= control target key start
LH: loop header
LB: loop body
LE: loop exit
PB: predicated region body
PF: predicated region fallthrough
CT: control target
= control target key end

     0   :  { %9 = vsyncpa [#allocation3], 0  ;;  %s331_s0 = inlined_call_operand.hbm [shape: f32[8,32], index: 0, kind: input, shape index: {}]   ;;  %s332_s1 = inlined_call_operand.hbm [shape: bf16[32,128], index: 1, kind: input, shape index: {}]   ;;  %s333_s2 = inlined_call_operand.vmem [shape: f32[1,128], index: 2, kind: input, shape index: {}]   ;;  %s334_s3 = inlined_call_operand.vmem [shape: f32[1,128], index: 3, kind: input, shape index: {}]   ;;  %s335_s4 = inlined_call_operand.hbm [shape: f32[8,128], index: 4, kind: output, shape index: {}]  }
   0x1   :  { %10 = vsyncpa [#allocation6], 0 }
   0x2   :  { %11 = vsyncpa [#allocation4], 0  ;;  %s250_s15 = smov [#allocation2]   ;;  %s251_s17 = smov [#allocation5]  }
   0x3   :  { %s18_s16 = sshll.u32 %s250_s15, 4  ;;  %s27_s18 = sshll.u32 %s251_s17, 4  ;;  %s19_s16 = int_to_ptr.vmem [resolvable:$true] %s18_s16  ;;  %s282_s18 = int_to_ptr.vmem [resolvable:$true] %s27_s18 }
   0x4   :  { %s178_s21 = scalar_lea.hbm %s331_s0, 128 }
   0x5   :  { %p179_p0 = scmp.ne.s32.totalorder %s331_s0, %s178_s21  ;;  %p182_p1 = scmp.lt.u32.totalorder %s178_s21, %s331_s0 }
   0x7   :  { %p184_p2 = pnand %p182_p1, %p179_p0 }
   0x9   :  { %187 = shalt.err (!%p184_p2)
}
   0xa   :  { %s188_s26 = scalar_lea.vmem %s19_s16, 128  ;;  %p193_p4 = scmp.lt.s32.totalorder %s19_s16, %s19_s16 }
   0xb   :  { %p189_p3 = scmp.ne.s32.totalorder %s19_s16, %s188_s26  ;;  %p194_p5 = scmp.lt.s32.totalorder %s188_s26, %s188_s26 }
   0xd   :  { %p195_p6 = por %p194_p5, %p193_p4 }
   0xf   :  { %p196_p7 = pnand %p195_p6, %p189_p3 }
  0x11   :  { %199 = shalt.err (!%p196_p7)
}
  0x12   :  { %21 = dma.hbm_to_vmem [thread:$0]  %s331_s0, 128, %s19_s16, [#allocation3]  }
  0x13   :  { %s200_s5 = scalar_lea.hbm %s332_s1, 256 }
  0x14   :  { %p201_p8 = scmp.ne.s32.totalorder %s332_s1, %s200_s5  ;;  %p204_p9 = scmp.lt.u32.totalorder %s200_s5, %s332_s1 }
  0x16   :  { %p206_p10 = pnand %p204_p9, %p201_p8 }
  0x18   :  { %209 = shalt.err (!%p206_p10)
}
  0x19   :  { %s210_s10 = scalar_lea.vmem %s282_s18, 256  ;;  %p215_p12 = scmp.lt.s32.totalorder %s282_s18, %s282_s18 }
  0x1a   :  { %p211_p11 = scmp.ne.s32.totalorder %s282_s18, %s210_s10  ;;  %p216_p13 = scmp.lt.s32.totalorder %s210_s10, %s210_s10 }
  0x1c   :  { %p217_p0 = por %p216_p13, %p215_p12 }
  0x1e   :  { %p218_p1 = pnand %p217_p0, %p211_p11 }
  0x20   :  { %221 = shalt.err (!%p218_p1)
}
  0x21   :  { %s252_s0 = smov 64   ;;  %s253_s11 = smov 4  }
  0x22   :  { %33 = dma.hbm_to_vmem [thread:$0]  %s332_s1, 256, %s282_s18, [#allocation6], %s252_s0, %s252_s0, %s253_s11  }
  0x23   :  { %244 = dma.done.wait [#allocation3], 128  }
  0x24   :  { %245 = vsyncadd [#allocation3], 4294967168 }
  0x25   :  { %246 = dma.done.wait [#allocation6], 256  }
  0x26   :  { %247 = vsyncadd [#allocation6], 4294967040  ;;  %v254_v0 = vmov 0.0   ;;  %vm255_vm0 = vmmov 0   ;;  %v172_v1 = vld [vmem:[#allocation5] sm:$0xff]   ;;  %v173_v2 = vld [vmem:[#allocation5 + $0x8] sm:$0xff]  }
  0x27   :  { %157 = vmatprep.subr.bf16.mxu0 %v254_v0  ;;  %161 = vmatprep.mubr.msk.bf16.mxu0 %vm255_vm0, %v254_v0  ;;  %v45_v3 = vld [vmem:[#allocation2] sm:$0xff]  ;;  %vm70_vm1 = vcmask 261120  }
  0x28   :  { %158 = vmatpush3.bf16.msra.mxu0 %v172_v1  ;;  %v46_v4 = vpack.c.bf16 %v45_v3, %v45_v3  ;;  %v149_v5 = vld [vmem:[%s333_s2] ss:$0 sm:$0xff]  ;;  %s256_s2 = smov [#allocation7]  }
  0x29   :  { %159 = vmatprep.subr.bf16.mxu0 %v254_v0  ;;  %v153_v10 = vld [vmem:[%s334_s3] ss:$0 sm:$0xff]  ;;  %s139_s17 = sshll.u32 %s256_s2, 4  ;;  %s140_s17 = int_to_ptr.vmem [resolvable:$true] %s139_s17 }
  0x2a   :  { %s222_s18 = scalar_lea.vmem %s140_s17, 128  ;;  %p227_p3 = scmp.lt.s32.totalorder %s140_s17, %s140_s17 }
  0x2b   :  { %p223_p2 = scmp.ne.s32.totalorder %s140_s17, %s222_s18  ;;  %p228_p4 = scmp.lt.s32.totalorder %s222_s18, %s222_s18 }
  0x2c   :  { %160 = vmatpush3.bf16.msra.mxu0 %v173_v2 }
  0x2d   :  { %p229_p5 = por %p228_p4, %p227_p3 }
  0x2f   :  { %162 = vmatmul.mubr.msk.bf16.vlgmr.msra.gmra.mrb[0].mxu0 %vm70_vm1, %v46_v4  ;;  %p230_p6 = pnand %p229_p5, %p223_p2 }
 0x102   :  { %v108_v6 = vpop.f32.mrb[0].mxu0 }
 0x103   :  { %v109_v7 = vadd.f32 %v149_v5, %v108_v6  ;;  %v163_v8 = vpop.f32.mrb[1].mxu0 }
 0x104   :  { %v111_v9 = vpop.f32.mrb[2].mxu0 }
 0x105   :  { %v114_v11 = vmax.f32 %v109_v7, 0.0  ;;  %v164_v12 = vpop.f32.mrb[3].mxu0 }
 0x107   :  { %v122_v13 = vadd.f32 %v153_v10, %v114_v11 }
 0x109   :  { %123 = vmax.xlane.f32.xlu0 %v122_v13 }
 0x196   :  { %v124_v14 = vpop.xlane.xlu0 %123 }
 0x197   :  { %v125_v15 = vsub.f32 %v122_v13, %v124_v14 }
 0x199   :  { %v126_v16 = vmul.f32 1.442695, %v125_v15 }
 0x19b   :  { %174 = vpow2.f32 %v126_v16 }
 0x1a5   :  { %v175_v17 = vpop.eup %174 }
 0x1a6   :  { %128 = vadd.xlane.f32.xlu0 %v175_v17 }
 0x233   :  { %v129_v18 = vpop.xlane.xlu0 %128 }
 0x234   :  { %176 = vrcp.f32 %v129_v18 }
 0x23e   :  { %v177_v19 = vpop.eup %176 }
 0x23f   :  { %v131_v20 = vmul.f32 %v177_v19, %v175_v17 }
 0x241   :  { %132 = vst [vmem:[#allocation7] sm:$0xff] %v131_v20 }
 0x242   :  { %233 = shalt.err (!%p230_p6)
}
 0x243   :  { %s234_s20 = scalar_lea.hbm %s335_s4, 128 }
 0x244   :  { %p235_p7 = scmp.ne.s32.totalorder %s335_s4, %s234_s20  ;;  %p238_p8 = scmp.lt.u32.totalorder %s234_s20, %s335_s4 }
 0x246   :  { %p240_p9 = pnand %p238_p8, %p235_p7 }
 0x248   :  { %243 = shalt.err (!%p240_p9)
}
 0x249   :  { %142 = dma.vmem_to_hbm [thread:$0]  %s140_s17, 128, %s335_s4, [#allocation4]  }
 0x24a   :  { %248 = dma.done.wait [#allocation4], 128  }
 0x24b   :  { %249 = vsyncadd [#allocation4], 4294967168 }
 0x24c   :  { %146 = vsyncpa [#allocation3], 1 }
 0x24d   :  { %147 = vsyncpa [#allocation6], 1 }
 0x24e   :  { %148 = vsyncpa [#allocation4], 1 }

// kernel: tpu_custom_call.1
= control target key start
LH: loop header
LB: loop body
LE: loop exit
PB: predicated region body
PF: predicated region fallthrough
CT: control target
= control target key end

     0   :  { %9 = vsyncpa [#allocation3], 0  ;;  %s331_s0 = inlined_call_operand.hbm [shape: f32[8,32], index: 0, kind: input, shape index: {}]   ;;  %s332_s1 = inlined_call_operand.hbm [shape: bf16[32,128], index: 1, kind: input, shape index: {}]   ;;  %s333_s2 = inlined_call_operand.vmem [shape: f32[1,128], index: 2, kind: input, shape index: {}]   ;;  %s334_s3 = inlined_call_operand.vmem [shape: f32[1,128], index: 3, kind: input, shape index: {}]   ;;  %s335_s4 = inlined_call_operand.hbm [shape: f32[8,128], index: 4, kind: output, shape index: {}]  }
   0x1   :  { %10 = vsyncpa [#allocation6], 0 }
   0x2   :  { %11 = vsyncpa [#allocation4], 0  ;;  %s250_s15 = smov [#allocation2]   ;;  %s251_s17 = smov [#allocation5]  }
   0x3   :  { %s18_s16 = sshll.u32 %s250_s15, 4  ;;  %s27_s18 = sshll.u32 %s251_s17, 4  ;;  %s19_s16 = int_to_ptr.vmem [resolvable:$true] %s18_s16  ;;  %s282_s18 = int_to_ptr.vmem [resolvable:$true] %s27_s18 }
   0x4   :  { %s178_s21 = scalar_lea.hbm %s331_s0, 128 }
   0x5   :  { %p179_p0 = scmp.ne.s32.totalorder %s331_s0, %s178_s21  ;;  %p182_p1 = scmp.lt.u32.totalorder %s178_s21, %s331_s0 }
   0x7   :  { %p184_p2 = pnand %p182_p1, %p179_p0 }
   0x9   :  { %187 = shalt.err (!%p184_p2)
}
   0xa   :  { %s188_s26 = scalar_lea.vmem %s19_s16, 128  ;;  %p193_p4 = scmp.lt.s32.totalorder %s19_s16, %s19_s16 }
   0xb   :  { %p189_p3 = scmp.ne.s32.totalorder %s19_s16, %s188_s26  ;;  %p194_p5 = scmp.lt.s32.totalorder %s188_s26, %s188_s26 }
   0xd   :  { %p195_p6 = por %p194_p5, %p193_p4 }
   0xf   :  { %p196_p7 = pnand %p195_p6, %p189_p3 }
  0x11   :  { %199 = shalt.err (!%p196_p7)
}
  0x12   :  { %21 = dma.hbm_to_vmem [thread:$0]  %s331_s0, 128, %s19_s16, [#allocation3]  }
  0x13   :  { %s200_s5 = scalar_lea.hbm %s332_s1, 256 }
  0x14   :  { %p201_p8 = scmp.ne.s32.totalorder %s332_s1, %s200_s5  ;;  %p204_p9 = scmp.lt.u32.totalorder %s200_s5, %s332_s1 }
  0x16   :  { %p206_p10 = pnand %p204_p9, %p201_p8 }
  0x18   :  { %209 = shalt.err (!%p206_p10)
}
  0x19   :  { %s210_s10 = scalar_lea.vmem %s282_s18, 256  ;;  %p215_p12 = scmp.lt.s32.totalorder %s282_s18, %s282_s18 }
  0x1a   :  { %p211_p11 = scmp.ne.s32.totalorder %s282_s18, %s210_s10  ;;  %p216_p13 = scmp.lt.s32.totalorder %s210_s10, %s210_s10 }
  0x1c   :  { %p217_p0 = por %p216_p13, %p215_p12 }
  0x1e   :  { %p218_p1 = pnand %p217_p0, %p211_p11 }
  0x20   :  { %221 = shalt.err (!%p218_p1)
}
  0x21   :  { %s252_s0 = smov 64   ;;  %s253_s11 = smov 4  }
  0x22   :  { %33 = dma.hbm_to_vmem [thread:$0]  %s332_s1, 256, %s282_s18, [#allocation6], %s252_s0, %s252_s0, %s253_s11  }
  0x23   :  { %244 = dma.done.wait [#allocation3], 128  }
  0x24   :  { %245 = vsyncadd [#allocation3], 4294967168 }
  0x25   :  { %246 = dma.done.wait [#allocation6], 256  }
  0x26   :  { %247 = vsyncadd [#allocation6], 4294967040  ;;  %v254_v0 = vmov 0.0   ;;  %vm255_vm0 = vmmov 0   ;;  %v172_v1 = vld [vmem:[#allocation5] sm:$0xff]   ;;  %v173_v2 = vld [vmem:[#allocation5 + $0x8] sm:$0xff]  }
  0x27   :  { %157 = vmatprep.subr.bf16.mxu0 %v254_v0  ;;  %161 = vmatprep.mubr.msk.bf16.mxu0 %vm255_vm0, %v254_v0  ;;  %v45_v3 = vld [vmem:[#allocation2] sm:$0xff]  ;;  %vm70_vm1 = vcmask 261120  }
  0x28   :  { %158 = vmatpush3.bf16.msra.mxu0 %v172_v1  ;;  %v46_v4 = vpack.c.bf16 %v45_v3, %v45_v3  ;;  %v149_v5 = vld [vmem:[%s333_s2] ss:$0 sm:$0xff]  ;;  %s256_s2 = smov [#allocation7]  }
  0x29   :  { %159 = vmatprep.subr.bf16.mxu0 %v254_v0  ;;  %v153_v10 = vld [vmem:[%s334_s3] ss:$0 sm:$0xff]  ;;  %s139_s17 = sshll.u32 %s256_s2, 4  ;;  %s140_s17 = int_to_ptr.vmem [resolvable:$true] %s139_s17 }
  0x2a   :  { %s222_s18 = scalar_lea.vmem %s140_s17, 128  ;;  %p227_p3 = scmp.lt.s32.totalorder %s140_s17, %s140_s17 }
  0x2b   :  { %p223_p2 = scmp.ne.s32.totalorder %s140_s17, %s222_s18  ;;  %p228_p4 = scmp.lt.s32.totalorder %s222_s18, %s222_s18 }
  0x2c   :  { %160 = vmatpush3.bf16.msra.mxu0 %v173_v2 }
  0x2d   :  { %p229_p5 = por %p228_p4, %p227_p3 }
  0x2f   :  { %162 = vmatmul.mubr.msk.bf16.vlgmr.msra.gmra.mrb[0].mxu0 %vm70_vm1, %v46_v4  ;;  %p230_p6 = pnand %p229_p5, %p223_p2 }
 0x102   :  { %v108_v6 = vpop.f32.mrb[0].mxu0 }
 0x103   :  { %v109_v7 = vadd.f32 %v149_v5, %v108_v6  ;;  %v163_v8 = vpop.f32.mrb[1].mxu0 }
 0x104   :  { %v111_v9 = vpop.f32.mrb[2].mxu0 }
 0x105   :  { %v114_v11 = vmax.f32 %v109_v7, 0.0  ;;  %v164_v12 = vpop.f32.mrb[3].mxu0 }
 0x107   :  { %v122_v13 = vadd.f32 %v153_v10, %v114_v11 }
 0x109   :  { %123 = vmax.xlane.f32.xlu0 %v122_v13 }
 0x196   :  { %v124_v14 = vpop.xlane.xlu0 %123 }
 0x197   :  { %v125_v15 = vsub.f32 %v122_v13, %v124_v14 }
 0x199   :  { %v126_v16 = vmul.f32 1.442695, %v125_v15 }
 0x19b   :  { %174 = vpow2.f32 %v126_v16 }
 0x1a5   :  { %v175_v17 = vpop.eup %174 }
 0x1a6   :  { %128 = vadd.xlane.f32.xlu0 %v175_v17 }
 0x233   :  { %v129_v18 = vpop.xlane.xlu0 %128 }
 0x234   :  { %176 = vrcp.f32 %v129_v18 }
 0x23e   :  { %v177_v19 = vpop.eup %176 }
 0x23f   :  { %v131_v20 = vmul.f32 %v177_v19, %v175_v17 }
 0x241   :  { %132 = vst [vmem:[#allocation7] sm:$0xff] %v131_v20 }
 0x242   :  { %233 = shalt.err (!%p230_p6)
}
 0x243   :  { %s234_s20 = scalar_lea.hbm %s335_s4, 128 }
 0x244   :  { %p235_p7 = scmp.ne.s32.totalorder %s335_s4, %s234_s20  ;;  %p238_p8 = scmp.lt.u32.totalorder %s234_s20, %s335_s4 }
 0x246   :  { %p240_p9 = pnand %p238_p8, %p235_p7 }
 0x248   :  { %243 = shalt.err (!%p240_p9)
}
 0x249   :  { %142 = dma.vmem_to_hbm [thread:$0]  %s140_s17, 128, %s335_s4, [#allocation4]  }
 0x24a   :  { %248 = dma.done.wait [#allocation4], 128  }
 0x24b   :  { %249 = vsyncadd [#allocation4], 4294967168 }
 0x24c   :  { %146 = vsyncpa [#allocation3], 1 }
 0x24d   :  { %147 = vsyncpa [#allocation6], 1 }
 0x24e   :  { %148 = vsyncpa [#allocation4], 1 }

</bundles_post_ra>
